<compile_context>
chip_gen: v6e
topology: v6e:2x2x1
jax: 0.10.0
libtpu: 0.0.40
codegen_flags: <defaults>
</compile_context>

<pallas_src>
import math

import jax
import jax.numpy as jnp
from jax.experimental import pallas as pl
from jax.experimental.pallas import tpu as pltpu


def _round_up(x, m):
    return ((x + m - 1) // m) * m


def _choose_pack(d_env, d_embed, max_pack=8):
    """Smallest row-packing factor making x loads and output stores lane-dense."""
    p_in = 128 // math.gcd(128, d_env)
    p_out = 128 // math.gcd(128, d_embed)
    p = p_in * p_out // math.gcd(p_in, p_out)  # lcm(p_in, p_out)
    if p <= max_pack:
        return p
    if p_out <= max_pack:
        return p_out  # at least lane-dense stores
    # TODO(synk): masked-store fallback for awkward d_embed (correct but slow).
    return 1


def pack_linear_embedding_params(weight, bias, pack):
    """Precompute once at module init (hoists kron/tile out of the per-call path).

    weight: [d_env, d_embed]; bias: [d_embed].
    Returns (w_bd, b_packed): block-diagonal kron(I_pack, W) and tiled f32 bias.
    """
    d_embed = weight.shape[1]
    w_bd = jnp.kron(jnp.eye(pack, dtype=weight.dtype), weight)
    b_packed = jnp.tile(bias.reshape(1, d_embed), (1, pack)).astype(jnp.float32)
    return w_bd, b_packed


def _linear_kernel(x_ref, w_ref, b_ref, o_ref):
    # x_ref: (TM//pack, pack*d_env)      marching tile over packed rows
    # w_ref: (pack*d_env, pack*d_embed)  VMEM-resident block-diagonal weight
    # b_ref: (1, pack*d_embed)           VMEM-resident packed bias (f32)
    # o_ref: (TM//pack, pack*d_embed)    lane-dense output tile
    acc = jnp.dot(x_ref[...], w_ref[...], preferred_element_type=jnp.float32)
    o_ref[...] = (acc + b_ref[...]).astype(o_ref.dtype)


def linear_embedding(x, weight, bias, *, tm=32768, out_dtype=None, packed=None):
    """x: [B, S, d_env]; weight: [d_env, d_embed]; bias: [d_embed]."""
    B, S, d_env = x.shape
    d_embed = weight.shape[1]
    M = B * S
    out_dtype = x.dtype if out_dtype is None else out_dtype
    # TODO(synk): downstream fusion (pos-emb add / layernorm / bf16 cast) would
    # cut the f32 writeback further; kept identical to nn.Linear by default.

    pack = _choose_pack(d_env, d_embed)
    if packed is None:
        w_bd, b_packed = pack_linear_embedding_params(weight, bias, pack)
    else:
        w_bd, b_packed = packed

    row_align = 8 * pack  # 8 sublanes of packed rows
    # Pad only to the packing/sublane alignment (<= 8*pack-1 rows), never to a
    # tile multiple: avoids an extra HBM pass over x.
    m_pad = _round_up(M, row_align)
    x2d = x.reshape(M, d_env)
    if m_pad != M:
        x2d = jnp.pad(x2d, ((0, m_pad - M), (0, 0)))
    x_packed = x2d.reshape(m_pad // pack, pack * d_env)

    out_cols = pack * d_embed
    out_rows = m_pad // pack

    # Tile sizing: amortize the ~0.35us/step pipeline overhead with a large
    # tile, but keep the grid >= ~8 steps (v7x megacore + pipeline depth) and
    # the double-buffered x+out blocks well under v7x's 32 MiB scoped VMEM.
    tm = max(row_align, _round_up(min(tm, m_pad), row_align))
    depth_cap = max(row_align, _round_up(pl.cdiv(m_pad, 8), row_align))
    tm = min(tm, depth_cap)
    grid = (pl.cdiv(m_pad, tm),)  # last block may be partial; Pallas masks it

    x_item = jnp.dtype(x.dtype).itemsize
    cost = pl.CostEstimate(
        flops=2 * out_rows * (pack * d_env) * out_cols,
        transcendentals=0,
        bytes_accessed=(
            m_pad * d_env * x_item
            + w_bd.size * jnp.dtype(w_bd.dtype).itemsize
            + b_packed.size * jnp.dtype(b_packed.dtype).itemsize
            + m_pad * d_embed * jnp.dtype(out_dtype).itemsize
        ),
    )

    out_packed = pl.pallas_call(
        _linear_kernel,
        out_shape=jax.ShapeDtypeStruct((out_rows, out_cols), out_dtype),
        grid_spec=pltpu.PrefetchScalarGridSpec(
            num_scalar_prefetch=0,
            grid=grid,
            in_specs=[
                # x tile marches along M; weight/bias stay resident in VMEM.
                pl.BlockSpec((tm // pack, pack * d_env), lambda i: (i, 0)),
                pl.BlockSpec((pack * d_env, out_cols), lambda i: (0, 0)),
                pl.BlockSpec((1, out_cols), lambda i: (0, 0)),
            ],
            out_specs=pl.BlockSpec((tm // pack, out_cols), lambda i: (i, 0)),
        ),
        compiler_params=pltpu.CompilerParams(
            dimension_semantics=("parallel",),
        ),
        cost_estimate=cost,
    )(x_packed, w_bd, b_packed)

    out2d = out_packed.reshape(m_pad, d_embed)[:M]
    return out2d.reshape(B, S, d_embed)


if __name__ == "__main__":
    # Small shapes consistent with the module: d_env=16, d_embed=32, B=2, S=8.
    B, S, d_env, d_embed = 2, 8, 16, 32

    key = jax.random.PRNGKey(0)
    kx, kw, kb = jax.random.split(key, 3)

    # Deterministic init mimicking nn.Linear: U(-1/sqrt(in), 1/sqrt(in)).
    bound = 1.0 / math.sqrt(d_env)
    weight = jax.random.uniform(kw, (d_env, d_embed), jnp.float32, -bound, bound)
    bias = jax.random.uniform(kb, (d_embed,), jnp.float32, -bound, bound)

    x = jax.random.normal(kx, (B, S, d_env), jnp.float32)

    out = linear_embedding(x, weight, bias)
    jax.block_until_ready(out)

    ref = x @ weight + bias
    assert out.shape == (B, S, d_embed)
    assert jnp.allclose(out, ref, atol=1e-5, rtol=1e-5)

    # Larger, tile-unaligned M exercising partial boundary blocks, plus jit
    # with the packed params precomputed once (hoisted out of the hot path).
    pack = _choose_pack(d_env, d_embed)
    packed = pack_linear_embedding_params(weight, bias, pack)
    fn = jax.jit(lambda xx: linear_embedding(xx, weight, bias, packed=packed))

    B2, S2 = 8, 1000  # M = 8000 -> ~8 grid steps, last one partial
    x_big = jax.random.normal(kx, (B2, S2, d_env), jnp.float32)
    out_big = fn(x_big)
    jax.block_until_ready(out_big)
    ref_big = x_big @ weight + bias
    assert out_big.shape == (B2, S2, d_embed)
    assert jnp.allclose(out_big, ref_big, atol=1e-5, rtol=1e-5)

    print("KERNEL_OK")
</pallas_src>

<mosaic_0001>
module attributes {stable_mosaic.version = 11 : i64} {
  func.func @_linear_kernel(%arg0: i32, %arg1: memref<8x128xf32, #tpu.memory_space<vmem>>, %arg2: memref<128x256xf32, #tpu.memory_space<vmem>>, %arg3: memref<1x256xf32, #tpu.memory_space<vmem>>, %arg4: memref<8x256xf32, #tpu.memory_space<vmem>>) attributes {dimension_semantics = [#tpu.dimension_semantics<parallel>], iteration_bounds = array<i64: 1>, scalar_prefetch = 0 : i64, scratch_operands = 0 : i64, tpu.core_type = #tpu.core_type<tc>, window_params = [{transform_indices = @transform_0, window_bounds = array<i64: 8, 128>}, {pipeline_mode = #tpu.pipeline_mode<synchronous>, transform_indices = @transform_1, window_bounds = array<i64: 128, 256>}, {pipeline_mode = #tpu.pipeline_mode<synchronous>, transform_indices = @transform_2, window_bounds = array<i64: 1, 256>}, {transform_indices = @transform_3, window_bounds = array<i64: 8, 256>}]} {
    %c0 = arith.constant 0 : index
    %c0_0 = arith.constant 0 : index
    %0 = vector.load %arg1[%c0, %c0_0] : memref<8x128xf32, #tpu.memory_space<vmem>>, vector<8x128xf32>
    %c0_1 = arith.constant 0 : index
    %c0_2 = arith.constant 0 : index
    %1 = vector.load %arg2[%c0_1, %c0_2] : memref<128x256xf32, #tpu.memory_space<vmem>>, vector<128x256xf32>
    %cst = arith.constant dense<0.000000e+00> : vector<8x256xf32>
    %2 = tpu.matmul %0, %1, %cst {dimension_numbers = #tpu.dot_dimension_numbers<[1], [0], [0], [1], [0, 0, 1, 1], [], []>} : vector<8x128xf32>, vector<128x256xf32>, vector<8x256xf32> -> vector<8x256xf32>
    %c0_3 = arith.constant 0 : index
    %c0_4 = arith.constant 0 : index
    %3 = vector.load %arg3[%c0_3, %c0_4] : memref<1x256xf32, #tpu.memory_space<vmem>>, vector<1x256xf32>
    %4 = vector.broadcast %3 : vector<1x256xf32> to vector<8x256xf32>
    %5 = arith.addf %2, %4 : vector<8x256xf32>
    %c0_5 = arith.constant 0 : index
    %c0_6 = arith.constant 0 : index
    %6 = vector.load %arg4[%c0_5, %c0_6] : memref<8x256xf32, #tpu.memory_space<vmem>>, vector<8x256xf32>
    tpu.vector_store %arg4[%c0_5, %c0_6], %5 {strides = array<i32>} : memref<8x256xf32, #tpu.memory_space<vmem>>, vector<8x256xf32>,
    return
  }
  func.func @transform_0(%arg0: i32) -> (i32, i32) {
    %c0_i32 = arith.constant 0 : i32
    %c0_i32_0 = arith.constant 0 : i32
    return %arg0, %c0_i32 : i32, i32
  }
  func.func @transform_1(%arg0: i32) -> (i32, i32) {
    %c0_i32 = arith.constant 0 : i32
    %c0_i32_0 = arith.constant 0 : i32
    %c0_i32_1 = arith.constant 0 : i32
    return %c0_i32, %c0_i32_0 : i32, i32
  }
  func.func @transform_2(%arg0: i32) -> (i32, i32) {
    %c0_i32 = arith.constant 0 : i32
    %c0_i32_0 = arith.constant 0 : i32
    %c0_i32_1 = arith.constant 0 : i32
    return %c0_i32, %c0_i32_0 : i32, i32
  }
  func.func @transform_3(%arg0: i32) -> (i32, i32) {
    %c0_i32 = arith.constant 0 : i32
    %c0_i32_0 = arith.constant 0 : i32
    return %arg0, %c0_i32 : i32, i32
  }
}

</mosaic_0001>

<bundles_post_ra>
// kernel: tpu_custom_call.1
= control target key start
LH: loop header
LB: loop body
LE: loop exit
PB: predicated region body
PF: predicated region fallthrough
CT: control target
= control target key end

     0   :  { %8 = vsyncpa [#allocation3], 0  ;;  %s285_s0 = inlined_call_operand.hbm [shape: f32[8,128], index: 0, kind: input, shape index: {}]   ;;  %s286_s1 = inlined_call_operand.hbm [shape: f32[128,256], index: 1, kind: input, shape index: {}]   ;;  %s287_s2 = inlined_call_operand.vmem [shape: f32[1,256], index: 2, kind: input, shape index: {}]   ;;  %s288_s3 = inlined_call_operand.hbm [shape: f32[8,256], index: 3, kind: output, shape index: {}]  }
   0x1   :  { %9 = vsyncpa [#allocation6], 0 }
   0x2   :  { %10 = vsyncpa [#allocation4], 0  ;;  %s247_s12 = smov [#allocation2]   ;;  %s248_s14 = smov [#allocation5]  }
   0x3   :  { %s17_s13 = sshll.u32 %s247_s12, 4  ;;  %s26_s15 = sshll.u32 %s248_s14, 4  ;;  %s18_s13 = int_to_ptr.vmem [resolvable:$true] %s17_s13  ;;  %s27_s15 = int_to_ptr.vmem [resolvable:$true] %s26_s15 }
   0x4   :  { %s189_s16 = scalar_lea.vmem %s18_s13, 128  ;;  %p194_p1 = scmp.lt.s32.totalorder %s18_s13, %s18_s13 }
   0x5   :  { %p190_p0 = scmp.ne.s32.totalorder %s18_s13, %s189_s16  ;;  %p195_p2 = scmp.lt.s32.totalorder %s189_s16, %s189_s16 }
   0x7   :  { %p196_p3 = por %p195_p2, %p194_p1 }
   0x9   :  { %p197_p4 = pnand %p196_p3, %p190_p0 }
   0xb   :  { %200 = shalt.err (!%p197_p4)
}
   0xc   :  { %20 = dma.hbm_to_vmem [thread:$0]  %s285_s0, 128, %s18_s13, [#allocation3]  }
   0xd   :  { %s209_s19 = scalar_lea.vmem %s27_s15, 4096  ;;  %p214_p6 = scmp.lt.s32.totalorder %s27_s15, %s27_s15 }
   0xe   :  { %p210_p5 = scmp.ne.s32.totalorder %s27_s15, %s209_s19  ;;  %p215_p7 = scmp.lt.s32.totalorder %s209_s19, %s209_s19 }
  0x10   :  { %p216_p8 = por %p215_p7, %p214_p6 }
  0x12   :  { %p217_p9 = pnand %p216_p8, %p210_p5 }
  0x14   :  { %220 = shalt.err (!%p217_p9)
}
  0x15   :  { %s249_s20 = smov 256   ;;  %s250_s21 = smov 16  }
  0x16   :  { %32 = dma.hbm_to_vmem [thread:$0]  %s286_s1, 4096, %s27_s15, [#allocation6], %s249_s20, %s249_s20, %s250_s21  }
  0x17   :  { %241 = dma.done.wait [#allocation3], 128  }
  0x18   :  { %242 = vsyncadd [#allocation3], 4294967168 }
  0x19   :  { %243 = dma.done.wait [#allocation6], 4096  }
  0x1a   :  { %244 = vsyncadd [#allocation6], 4294963200  ;;  %v251_v0 = vmov 0.0   ;;  %v73_v1 = vld [vmem:[#allocation5 + $0xf8] sm:$0xff]  ;;  %v72_v2 = vld [vmem:[#allocation5 + $0xf0] sm:$0xff]  ;;  %v76_v34 = vlaneseq  ;;  %s252_s24 = smov [#allocation7]  }
  0x1b   :  { %150 = vmatprep.mubr.f32.mxu0 %v251_v0  ;;  %v71_v3 = vld [vmem:[#allocation5 + $0xe8] sm:$0xff]  ;;  %86 = vmatprep.subr.mxu0 %v73_v1  ;;  %v70_v4 = vld [vmem:[#allocation5 + $0xe0] sm:$0xff]  ;;  %v69_v5 = vld [vmem:[#allocation5 + $0xd8] sm:$0xff]  ;;  %s165_s25 = sshll.u32 %s252_s24, 4  ;;  %s166_s25 = int_to_ptr.vmem [resolvable:$true] %s165_s25 }
  0x1c   :  { %87 = vmatpush1.msra.mxu0 %v72_v2  ;;  %v68_v6 = vld [vmem:[#allocation5 + $0xd0] sm:$0xff]  ;;  %v67_v7 = vld [vmem:[#allocation5 + $0xc8] sm:$0xff]  ;;  %v66_v8 = vld [vmem:[#allocation5 + $0xc0] sm:$0xff]  ;;  %v77_v35 = vshrl.u32 %v76_v34, 7  ;;  %s221_s26 = scalar_lea.vmem %s166_s25, 256  ;;  %p226_p11 = scmp.lt.s32.totalorder %s166_s25, %s166_s25 }
  0x1d   :  { %88 = vmatprep.subr.mxu0 %v71_v3  ;;  %v65_v9 = vld [vmem:[#allocation5 + $0xb8] sm:$0xff]  ;;  %v64_v10 = vld [vmem:[#allocation5 + $0xb0] sm:$0xff]  ;;  %v63_v11 = vld [vmem:[#allocation5 + $0xa8] sm:$0xff]  ;;  %p222_p10 = scmp.ne.s32.totalorder %s166_s25, %s221_s26  ;;  %p227_p12 = scmp.lt.s32.totalorder %s221_s26, %s221_s26 }
  0x1e   :  { %89 = vmatpush1.msra.mxu0 %v70_v4  ;;  %v62_v12 = vld [vmem:[#allocation5 + $0xa0] sm:$0xff]  ;;  %v61_v13 = vld [vmem:[#allocation5 + $0x98] sm:$0xff]  ;;  %v60_v14 = vld [vmem:[#allocation5 + $0x90] sm:$0xff]  ;;  %v78_v36 = vsub.s32 0, %v77_v35  ;;  %v82_v38 = vsub.s32 1, %v77_v35 }
  0x1f   :  { %90 = vmatprep.subr.mxu0 %v69_v5  ;;  %v59_v15 = vld [vmem:[#allocation5 + $0x88] sm:$0xff]  ;;  %v58_v16 = vld [vmem:[#allocation5 + $0x80] sm:$0xff]  ;;  %v57_v17 = vld [vmem:[#allocation5 + $0x78] sm:$0xff]  ;;  %p228_p13 = por %p227_p12, %p226_p11 }
  0x20   :  { %91 = vmatpush1.msra.mxu0 %v68_v6  ;;  %v56_v18 = vld [vmem:[#allocation5 + $0x70] sm:$0xff]  ;;  %v55_v19 = vld [vmem:[#allocation5 + $0x68] sm:$0xff]  ;;  %v54_v20 = vld [vmem:[#allocation5 + $0x60] sm:$0xff] }
  0x21   :  { %92 = vmatprep.subr.mxu0 %v67_v7  ;;  %v53_v21 = vld [vmem:[#allocation5 + $0x58] sm:$0xff]  ;;  %v52_v22 = vld [vmem:[#allocation5 + $0x50] sm:$0xff]  ;;  %v51_v23 = vld [vmem:[#allocation5 + $0x48] sm:$0xff]  ;;  %p229_p0 = pnand %p228_p13, %p222_p10 }
  0x22   :  { %93 = vmatpush1.msra.mxu0 %v66_v8  ;;  %v50_v24 = vld [vmem:[#allocation5 + $0x40] sm:$0xff]  ;;  %v49_v25 = vld [vmem:[#allocation5 + $0x38] sm:$0xff]  ;;  %v48_v26 = vld [vmem:[#allocation5 + $0x30] sm:$0xff] }
  0x23   :  { %94 = vmatprep.subr.mxu0 %v65_v9  ;;  %v47_v27 = vld [vmem:[#allocation5 + $0x28] sm:$0xff]  ;;  %v46_v28 = vld [vmem:[#allocation5 + $0x20] sm:$0xff]  ;;  %v45_v29 = vld [vmem:[#allocation5 + $0x18] sm:$0xff] }
  0x24   :  { %95 = vmatpush1.msra.mxu0 %v64_v10  ;;  %v44_v30 = vld [vmem:[#allocation5 + $0x10] sm:$0xff]  ;;  %v43_v31 = vld [vmem:[#allocation5 + $0x8] sm:$0xff]  ;;  %v42_v32 = vld [vmem:[#allocation5] sm:$0xff] }
  0x25   :  { %96 = vmatprep.subr.mxu0 %v63_v11  ;;  %v41_v33 = vld [vmem:[#allocation2] sm:$0xff] }
  0x26   :  { %97 = vmatpush1.msra.mxu0 %v62_v12  ;;  %v74_v37 = vld [vmem:[%s287_s2] sm:$0x3] }
  0x27   :  { %98 = vmatprep.subr.mxu0 %v61_v13  ;;  %v79_v39 = vrot.slane %v74_v37, %v78_v36  ;;  %v83_v40 = vrot.slane %v74_v37, %v82_v38 }
  0x28   :  { %99 = vmatpush1.msra.mxu0 %v60_v14 }
  0x29   :  { %100 = vmatprep.subr.mxu0 %v59_v15 }
  0x2a   :  { %101 = vmatpush1.msra.mxu0 %v58_v16 }
  0x2b   :  { %102 = vmatprep.subr.mxu0 %v57_v17 }
  0x2c   :  { %103 = vmatpush1.msra.mxu0 %v56_v18 }
  0x2d   :  { %104 = vmatprep.subr.mxu0 %v55_v19 }
  0x2e   :  { %105 = vmatpush1.msra.mxu0 %v54_v20 }
  0x2f   :  { %106 = vmatprep.subr.mxu0 %v53_v21 }
  0x30   :  { %107 = vmatpush1.msra.mxu0 %v52_v22 }
  0x31   :  { %108 = vmatprep.subr.mxu0 %v51_v23 }
  0x32   :  { %109 = vmatpush1.msra.mxu0 %v50_v24 }
  0x33   :  { %110 = vmatprep.subr.mxu0 %v49_v25 }
  0x34   :  { %111 = vmatpush1.msra.mxu0 %v48_v26 }
  0x35   :  { %112 = vmatprep.subr.mxu0 %v47_v27 }
  0x36   :  { %113 = vmatpush1.msra.mxu0 %v46_v28 }
  0x37   :  { %114 = vmatprep.subr.mxu0 %v45_v29 }
  0x38   :  { %115 = vmatpush1.msra.mxu0 %v44_v30 }
  0x39   :  { %116 = vmatprep.subr.mxu0 %v43_v31 }
  0x3a   :  { %117 = vmatpush1.msra.mxu0 %v42_v32 }
  0x3b   :  { %151 = vmatmul.mubr.f32.vlgmr.msra.gmra.mxu0 %v41_v33 }
  0xfb   :  { %v152_v41 = vpop.f32.mrf.mxu0 }
  0xfc   :  { %v153_v42 = vadd.f32 %v152_v41, %v79_v39 }
  0xfd   :  { %v154_v43 = vpop.f32.mrf.mxu0 }
  0xfe   :  { %157 = vst [vmem:[#allocation7] sm:$0xff] %v153_v42  ;;  %v155_v44 = vadd.f32 %v154_v43, %v83_v40 }
 0x100   :  { %158 = vst [vmem:[#allocation7 + $0x8] sm:$0xff] %v155_v44 }
 0x101   :  { %232 = shalt.err (!%p229_p0)
}
 0x102   :  { %168 = dma.vmem_to_hbm [thread:$0]  %s166_s25, 256, %s288_s3, [#allocation4]  }
 0x103   :  { %245 = dma.done.wait [#allocation4], 256  }
 0x104   :  { %246 = vsyncadd [#allocation4], 4294967040 }
 0x105   :  { %172 = vsyncpa [#allocation3], 1 }
 0x106   :  { %173 = vsyncpa [#allocation6], 1 }
 0x107   :  { %174 = vsyncpa [#allocation4], 1 }

</bundles_post_ra>
